<compile_context>
chip_gen: v7x
topology: tpu7x:2x2x1
jax: 0.10.0
libtpu: 0.0.40
codegen_flags: <defaults>
</compile_context>

<pallas_src>
import jax
import jax.numpy as jnp
from jax.experimental import pallas as pl
from jax.experimental.pallas import tpu as pltpu


def _make_bridger_kernel(n):
    """Build a kernel doing n concurrent HBM->HBM DMA copies.

    Kernel signature: (in_0..in_{n-1}, out_0..out_{n-1}, dma_sems)
    All refs live in HBM (memory_space=pl.ANY); no VMEM staging.
    """

    def kernel(*args):
        in_refs = args[:n]
        out_refs = args[n:2 * n]
        sem = args[2 * n]  # DMA semaphore array, one slot per tensor

        copies = [
            pltpu.make_async_copy(in_refs[i], out_refs[i], sem.at[i])
            for i in range(n)
        ]
        # Issue every DMA first so they are all in flight concurrently ...
        for c in copies:
            c.start()
        # ... then block until each one has landed.
        for c in copies:
            c.wait()

    return kernel


def bridger(x_list):
    """JAX/Pallas equivalent of Bridger.forward: identity over each tensor.

    One fused pallas_call for the whole list; each tensor is copied with a
    direct HBM->HBM DMA in its native layout (no reshape glue needed).
    """
    xs = list(x_list)
    if not xs:
        return []

    n = len(xs)
    out_shape = tuple(jax.ShapeDtypeStruct(x.shape, x.dtype) for x in xs)

    outs = pl.pallas_call(
        _make_bridger_kernel(n),
        out_shape=out_shape,
        in_specs=[pl.BlockSpec(memory_space=pl.ANY) for _ in range(n)],
        out_specs=tuple(pl.BlockSpec(memory_space=pl.ANY) for _ in range(n)),
        scratch_shapes=[pltpu.SemaphoreType.DMA((n,))],
    )(*xs)

    return list(outs)


if __name__ == "__main__":
    key = jax.random.PRNGKey(0)
    k1, k2, k3 = jax.random.split(key, 3)

    # Bridger receives an iterable of feature maps (ResUNet encoder outputs), NCHW.
    x = [
        jax.random.normal(k1, (2, 4, 16, 16), dtype=jnp.float32),
        jax.random.normal(k2, (2, 8, 8, 8), dtype=jnp.float32),
        jax.random.normal(k3, (2, 16, 4, 4), dtype=jnp.float32),
    ]

    outs = bridger(x)
    outs = [jax.block_until_ready(o) for o in outs]

    for xi, oi in zip(x, outs):
        assert oi.shape == xi.shape and oi.dtype == xi.dtype
        assert bool(jnp.all(oi == xi))

    print("KERNEL_OK")
</pallas_src>

<mosaic_0001>
module attributes {stable_mosaic.version = 11 : i64} {
  func.func @kernel(%arg0: memref<2x4x16x16xf32, #tpu.memory_space<any>>, %arg1: memref<2x8x8x8xf32, #tpu.memory_space<any>>, %arg2: memref<2x16x4x4xf32, #tpu.memory_space<any>>, %arg3: memref<2x4x16x16xf32, #tpu.memory_space<any>>, %arg4: memref<2x8x8x8xf32, #tpu.memory_space<any>>, %arg5: memref<2x16x4x4xf32, #tpu.memory_space<any>>, %arg6: memref<3x!tpu.dma_semaphore, #tpu.memory_space<semaphore_mem>>) attributes {dimension_semantics = [], scalar_prefetch = 0 : i64, scratch_operands = 1 : i64, tpu.core_type = #tpu.core_type<tc>} {
    %c0_i32 = arith.constant 0 : i32
    %0 = tpu.memref_slice %arg6[%c0_i32] : memref<3x!tpu.dma_semaphore, #tpu.memory_space<semaphore_mem>> -> memref<1x!tpu.dma_semaphore, #tpu.memory_space<semaphore_mem>>
    %1 = tpu.memref_squeeze %0 : memref<1x!tpu.dma_semaphore, #tpu.memory_space<semaphore_mem>> -> memref<!tpu.dma_semaphore, #tpu.memory_space<semaphore_mem>>
    tpu.enqueue_dma source(%arg0 : memref<2x4x16x16xf32, #tpu.memory_space<any>>) target(%arg3 : memref<2x4x16x16xf32, #tpu.memory_space<any>>) target_semaphore(%1 : memref<!tpu.dma_semaphore, #tpu.memory_space<semaphore_mem>>)
    %c1_i32 = arith.constant 1 : i32
    %2 = tpu.memref_slice %arg6[%c1_i32] : memref<3x!tpu.dma_semaphore, #tpu.memory_space<semaphore_mem>> -> memref<1x!tpu.dma_semaphore, #tpu.memory_space<semaphore_mem>>
    %3 = tpu.memref_squeeze %2 : memref<1x!tpu.dma_semaphore, #tpu.memory_space<semaphore_mem>> -> memref<!tpu.dma_semaphore, #tpu.memory_space<semaphore_mem>>
    tpu.enqueue_dma source(%arg1 : memref<2x8x8x8xf32, #tpu.memory_space<any>>) target(%arg4 : memref<2x8x8x8xf32, #tpu.memory_space<any>>) target_semaphore(%3 : memref<!tpu.dma_semaphore, #tpu.memory_space<semaphore_mem>>)
    %c2_i32 = arith.constant 2 : i32
    %4 = tpu.memref_slice %arg6[%c2_i32] : memref<3x!tpu.dma_semaphore, #tpu.memory_space<semaphore_mem>> -> memref<1x!tpu.dma_semaphore, #tpu.memory_space<semaphore_mem>>
    %5 = tpu.memref_squeeze %4 : memref<1x!tpu.dma_semaphore, #tpu.memory_space<semaphore_mem>> -> memref<!tpu.dma_semaphore, #tpu.memory_space<semaphore_mem>>
    tpu.enqueue_dma source(%arg2 : memref<2x16x4x4xf32, #tpu.memory_space<any>>) target(%arg5 : memref<2x16x4x4xf32, #tpu.memory_space<any>>) target_semaphore(%5 : memref<!tpu.dma_semaphore, #tpu.memory_space<semaphore_mem>>)
    %c0_i32_0 = arith.constant 0 : i32
    %6 = tpu.memref_slice %arg6[%c0_i32_0] : memref<3x!tpu.dma_semaphore, #tpu.memory_space<semaphore_mem>> -> memref<1x!tpu.dma_semaphore, #tpu.memory_space<semaphore_mem>>
    %7 = tpu.memref_squeeze %6 : memref<1x!tpu.dma_semaphore, #tpu.memory_space<semaphore_mem>> -> memref<!tpu.dma_semaphore, #tpu.memory_space<semaphore_mem>>
    tpu.wait_dma2 semaphore(%7 : memref<!tpu.dma_semaphore, #tpu.memory_space<semaphore_mem>>) src(%arg0 : memref<2x4x16x16xf32, #tpu.memory_space<any>>) dst(%arg3 : memref<2x4x16x16xf32, #tpu.memory_space<any>>)
    %c1_i32_1 = arith.constant 1 : i32
    %8 = tpu.memref_slice %arg6[%c1_i32_1] : memref<3x!tpu.dma_semaphore, #tpu.memory_space<semaphore_mem>> -> memref<1x!tpu.dma_semaphore, #tpu.memory_space<semaphore_mem>>
    %9 = tpu.memref_squeeze %8 : memref<1x!tpu.dma_semaphore, #tpu.memory_space<semaphore_mem>> -> memref<!tpu.dma_semaphore, #tpu.memory_space<semaphore_mem>>
    tpu.wait_dma2 semaphore(%9 : memref<!tpu.dma_semaphore, #tpu.memory_space<semaphore_mem>>) src(%arg1 : memref<2x8x8x8xf32, #tpu.memory_space<any>>) dst(%arg4 : memref<2x8x8x8xf32, #tpu.memory_space<any>>)
    %c2_i32_2 = arith.constant 2 : i32
    %10 = tpu.memref_slice %arg6[%c2_i32_2] : memref<3x!tpu.dma_semaphore, #tpu.memory_space<semaphore_mem>> -> memref<1x!tpu.dma_semaphore, #tpu.memory_space<semaphore_mem>>
    %11 = tpu.memref_squeeze %10 : memref<1x!tpu.dma_semaphore, #tpu.memory_space<semaphore_mem>> -> memref<!tpu.dma_semaphore, #tpu.memory_space<semaphore_mem>>
    tpu.wait_dma2 semaphore(%11 : memref<!tpu.dma_semaphore, #tpu.memory_space<semaphore_mem>>) src(%arg2 : memref<2x16x4x4xf32, #tpu.memory_space<any>>) dst(%arg5 : memref<2x16x4x4xf32, #tpu.memory_space<any>>)
    return
  }
}

</mosaic_0001>

<bundles_post_ra>
// kernel: tpu_custom_call.1
= control target key start
LH: loop header
LB: loop body
LE: loop exit
PB: predicated region body
PF: predicated region fallthrough
CT: control target
= control target key end

     0   :  { %s336_s0 = inlined_call_operand.vmem [shape: f32[2,4,16,16], index: 0, kind: input, shape index: {}]   ;;  %s337_s3 = inlined_call_operand.hbm [shape: f32[2,4,16,16], index: 3, kind: output, shape index: {0}]   ;;  %s338_s1 = inlined_call_operand.hbm [shape: f32[2,8,8,8], index: 1, kind: input, shape index: {}]   ;;  %s339_s4 = inlined_call_operand.hbm [shape: f32[2,8,8,8], index: 4, kind: output, shape index: {1}]   ;;  %s340_s2 = inlined_call_operand.vmem [shape: f32[2,16,4,4], index: 2, kind: input, shape index: {}]   ;;  %s341_s5 = inlined_call_operand.vmem [shape: f32[2,16,4,4], index: 5, kind: output, shape index: {2}]  }
   0x1   :  { %s18_s20 = sshll.u32 %s336_s0, 4  ;;  %s19_s20 = int_to_ptr.vmem [resolvable:$true] %s18_s20 }
   0x2   :  { %s158_s21 = scalar_lea.vmem %s19_s20, 2048  ;;  %p163_p1 = scmp.lt.s32.totalorder %s19_s20, %s19_s20 }
   0x3   :  { %p159_p0 = scmp.ne.s32.totalorder %s19_s20, %s158_s21  ;;  %p164_p2 = scmp.lt.s32.totalorder %s158_s21, %s158_s21 }
   0x5   :  { %p165_p3 = por %p164_p2, %p163_p1 }
   0x7   :  { %p166_p4 = pnand %p165_p3, %p159_p0 }
   0x9   :  { %169 = shalt.err (!%p166_p4)  }
   0xa   :  { %s170_s24 = scalar_lea.hbm %s337_s3, 2048 }
   0xb   :  { %p171_p5 = scmp.ne.s32.totalorder %s337_s3, %s170_s24  ;;  %p174_p6 = scmp.lt.u32.totalorder %s170_s24, %s337_s3 }
   0xd   :  { %p176_p7 = pnand %p174_p6, %p171_p5 }
   0xf   :  { %179 = shalt.err (!%p176_p7)  }
  0x10   :  { %21 = dma.vmem_to_hbm [thread:$0]  %s19_s20, 2048, %s337_s3, [#allocation2] }
  0x11   :  { %s186_s30 = smov [#allocation2 + $0x1]   ;;  %s187_s6 = smov [#allocation7]  }
  0x12   :  { %s188_s7 = smov 0  }
  0x13   :  { %35 = dma.general %s338_s1, 2048, %s339_s4, %s186_s30, %s187_s6, [#allocation8], %s188_s7, 0  }
  0x14   :  { %v69_v0 = vld [vmem:[%s340_s2] sm:$0xff]  ;;  %v71_v1 = vld [vmem:[%s340_s2 + $0x8] sm:$0xff]  ;;  %v73_v2 = vld [vmem:[%s340_s2 + $0x10] sm:$0xff] }
  0x15   :  { %70 = vst [vmem:[%s341_s5] sm:$0xff] %v69_v0  ;;  %72 = vst [vmem:[%s341_s5 + $0x8] sm:$0xff] %v71_v1  ;;  %v75_v3 = vld [vmem:[%s340_s2 + $0x18] sm:$0xff]  ;;  %v77_v4 = vld [vmem:[%s340_s2 + $0x20] sm:$0xff] }
  0x16   :  { %74 = vst [vmem:[%s341_s5 + $0x10] sm:$0xff] %v73_v2  ;;  %v79_v5 = vld [vmem:[%s340_s2 + $0x28] sm:$0xff]  ;;  %76 = vst [vmem:[%s341_s5 + $0x18] sm:$0xff] %v75_v3  ;;  %v81_v6 = vld [vmem:[%s340_s2 + $0x30] sm:$0xff] }
  0x17   :  { %78 = vst [vmem:[%s341_s5 + $0x20] sm:$0xff] %v77_v4  ;;  %80 = vst [vmem:[%s341_s5 + $0x28] sm:$0xff] %v79_v5  ;;  %v83_v7 = vld [vmem:[%s340_s2 + $0x38] sm:$0xff]  ;;  %v85_v8 = vld [vmem:[%s340_s2 + $0x40] sm:$0xff] }
  0x18   :  { %82 = vst [vmem:[%s341_s5 + $0x30] sm:$0xff] %v81_v6  ;;  %84 = vst [vmem:[%s341_s5 + $0x38] sm:$0xff] %v83_v7  ;;  %v87_v9 = vld [vmem:[%s340_s2 + $0x48] sm:$0xff]  ;;  %v89_v10 = vld [vmem:[%s340_s2 + $0x50] sm:$0xff] }
  0x19   :  { %86 = vst [vmem:[%s341_s5 + $0x40] sm:$0xff] %v85_v8  ;;  %v91_v11 = vld [vmem:[%s340_s2 + $0x58] sm:$0xff]  ;;  %88 = vst [vmem:[%s341_s5 + $0x48] sm:$0xff] %v87_v9  ;;  %v93_v12 = vld [vmem:[%s340_s2 + $0x60] sm:$0xff] }
  0x1a   :  { %90 = vst [vmem:[%s341_s5 + $0x50] sm:$0xff] %v89_v10  ;;  %92 = vst [vmem:[%s341_s5 + $0x58] sm:$0xff] %v91_v11  ;;  %v95_v13 = vld [vmem:[%s340_s2 + $0x68] sm:$0xff]  ;;  %v97_v14 = vld [vmem:[%s340_s2 + $0x70] sm:$0xff] }
  0x1b   :  { %94 = vst [vmem:[%s341_s5 + $0x60] sm:$0xff] %v93_v12  ;;  %96 = vst [vmem:[%s341_s5 + $0x68] sm:$0xff] %v95_v13  ;;  %v99_v15 = vld [vmem:[%s340_s2 + $0x78] sm:$0xff] }
  0x1c   :  { %98 = vst [vmem:[%s341_s5 + $0x70] sm:$0xff] %v97_v14  ;;  %100 = vst [vmem:[%s341_s5 + $0x78] sm:$0xff] %v99_v15 }
  0x1d   :  { %108 = vsyncadd [#allocation2 + $0x2], 2048 }
  0x1e   :  { %180 = dma.done.wait [#allocation2], 2048 }
  0x1f   :  { %181 = vsyncadd [#allocation2], 4294965248 }
  0x20   :  { %182 = dma.done.wait [#allocation2 + $0x1], 2048 }
  0x21   :  { %183 = vsyncadd [#allocation2 + $0x1], 4294965248 }
  0x22   :  { %184 = dma.done.wait [#allocation2 + $0x2], 2048 }
  0x23   :  { %185 = vsyncadd [#allocation2 + $0x2], 4294965248 }
  0x24   :  { %124 = vsyncmov [#allocation2] }
  0x27   :  { %s125_s17 = vpop.sfrf %124 }
  0x28   :  { %p152_p8 = scmp.ne.s32.totalorder %s125_s17, 0 }
  0x2a   :  { %129 = shalt.err (%p152_p8)  }
  0x2b   :  { %131 = vsyncmov [#allocation2 + $0x1] }
  0x2e   :  { %s132_s18 = vpop.sfrf %131 }
  0x2f   :  { %p153_p9 = scmp.ne.s32.totalorder %s132_s18, 0 }
  0x31   :  { %136 = shalt.err (%p153_p9)  }
  0x32   :  { %138 = vsyncmov [#allocation2 + $0x2] }
  0x35   :  { %s139_s2 = vpop.sfrf %138 }
  0x36   :  { %p154_p10 = scmp.ne.s32.totalorder %s139_s2, 0 }
  0x38   :  { %143 = shalt.err (%p154_p10)  }

</bundles_post_ra>
